<compile_context>
chip_gen: v7x
topology: tpu7x:2x2x1
jax: 0.10.0
libtpu: 0.0.40
codegen_flags: <defaults>
</compile_context>

<pallas_src>
import functools

import jax
import jax.numpy as jnp
from jax import lax
from jax.experimental import pallas as pl
from jax.experimental.pallas import tpu as pltpu


# ---------------------------------------------------------------------------
# Stage 1 kernel: pointwise convs (k -> 64 -> 128 -> 1024) with ReLU on the
# first two layers; layer-3 bias/ReLU are hoisted out.  The (1, 8, 1024)
# output block is resident across the (last, "arbitrary") N-tile axis and
# holds an 8-sublane partial running max; it is collapsed in stage 2.
# ---------------------------------------------------------------------------
def _conv_pool_kernel(x_ref, w1, b1, w2, b2, w3, o_ref, *, tn, n_valid):
    n_id = pl.program_id(1)

    @pl.when(n_id == 0)
    def _():
        o_ref[...] = jnp.full(o_ref.shape, -jnp.inf, dtype=o_ref.dtype)

    # x block: (1, k, TN) channels-major straight from HBM.  Contract the k
    # axis directly (transposed-LHS matmul) -- no explicit transpose.
    x = x_ref[0].astype(jnp.bfloat16)                          # (k, TN) bf16
    h = lax.dot_general(x, w1[...],
                        dimension_numbers=(((0,), (0,)), ((), ())),
                        preferred_element_type=jnp.float32) + b1[...]
    h = jnp.maximum(h, 0.0)                                    # (TN, 64)
    h = jnp.dot(h.astype(jnp.bfloat16), w2[...],
                preferred_element_type=jnp.float32) + b2[...]
    h = jnp.maximum(h, 0.0)                                    # (TN, 128)
    # Layer 3: matmul only; bias + ReLU applied once to the pooled row later.
    h = jnp.dot(h.astype(jnp.bfloat16), w3[...],
                preferred_element_type=jnp.float32)            # (TN, 1024) f32

    # Mask padded / out-of-bounds points (static check: only emitted when the
    # last tile is partial; must stay AFTER the last matmul).
    if n_valid % tn != 0:
        rows = lax.broadcasted_iota(jnp.int32, (tn, 1), 0) + n_id * tn
        h = jnp.where(rows < n_valid, h, -jnp.inf)

    # Fold TN rows down to an 8-sublane partial max (pairwise VPU maxes only;
    # no per-tile sublane reduce, no 1-sublane masked stores).
    if tn % 8 == 0:
        part = jnp.max(h.reshape(tn // 8, 8, 1024), axis=0)    # (8, 1024)
    else:
        part = jnp.broadcast_to(jnp.max(h, axis=0, keepdims=True), (8, 1024))

    o_ref[0] = jnp.maximum(o_ref[0], part)


# ---------------------------------------------------------------------------
# Stage 2 kernel: collapse the 8-sublane partial max, apply the hoisted
# layer-3 bias + ReLU, then the FC stack (1024 -> 512 -> 256 -> k*k).  The
# identity matrix is folded into fb3.  Batched over all B rows.
# ---------------------------------------------------------------------------
def _fc_kernel(g_ref, b3, fw1, fb1, fw2, fb2, fw3, fb3, o_ref):
    g = jnp.max(g_ref[...], axis=1)                            # (TB, 1024) f32
    g = jnp.maximum(g + b3[...], 0.0)                          # hoisted bias+ReLU
    h = jnp.dot(g.astype(jnp.bfloat16), fw1[...],
                preferred_element_type=jnp.float32) + fb1[...]
    h = jnp.maximum(h, 0.0)
    h = jnp.dot(h.astype(jnp.bfloat16), fw2[...],
                preferred_element_type=jnp.float32) + fb2[...]
    h = jnp.maximum(h, 0.0)
    o_ref[...] = jnp.dot(h.astype(jnp.bfloat16), fw3[...],
                         preferred_element_type=jnp.float32) + fb3[...]


def fold_bn(w, b, gamma, beta, mean, var, eps=1e-5):
    """Fold inference-mode BatchNorm into a (Cin, Cout) weight + (1, Cout) bias."""
    scale = gamma / jnp.sqrt(var + eps)                        # (Cout,)
    w_eff = w * scale[None, :]
    b_eff = (b - mean) * scale + beta
    return w_eff.astype(jnp.float32), b_eff.reshape(1, -1).astype(jnp.float32)


def init_params(key, k):
    conv_ch = [k, 64, 128, 1024]
    fc_ch = [1024, 512, 256, k * k]
    params = []
    keys = jax.random.split(key, 32)
    ki = 0

    def nrm(shape, scale=0.05):
        nonlocal ki
        out = scale * jax.random.normal(keys[ki], shape, dtype=jnp.float32)
        ki += 1
        return out

    # conv layers (all followed by BN)
    for i in range(1, len(conv_ch)):
        cin, cout = conv_ch[i - 1], conv_ch[i]
        w = nrm((cin, cout))
        b = nrm((cout,))
        gamma = 1.0 + nrm((cout,), 0.01)
        beta = nrm((cout,), 0.01)
        mean = nrm((cout,), 0.01)
        var = 1.0 + jnp.abs(nrm((cout,), 0.01))
        params.extend(fold_bn(w, b, gamma, beta, mean, var))

    # fc layers: first two have BN, last one is plain Linear
    for i in range(1, len(fc_ch)):
        cin, cout = fc_ch[i - 1], fc_ch[i]
        w = nrm((cin, cout))
        b = nrm((cout,))
        if i != len(fc_ch) - 1:
            gamma = 1.0 + nrm((cout,), 0.01)
            beta = nrm((cout,), 0.01)
            mean = nrm((cout,), 0.01)
            var = 1.0 + jnp.abs(nrm((cout,), 0.01))
            params.extend(fold_bn(w, b, gamma, beta, mean, var))
        else:
            params.extend([w.astype(jnp.float32),
                           b.reshape(1, -1).astype(jnp.float32)])
    return params


def stnkd_forward(x, params, k):
    """x: (B, k, N) float32 (same NCW layout as the PyTorch Conv1d input)."""
    (w1, b1, w2, b2, w3, b3, fw1, fb1, fw2, fb2, fw3, fb3) = params
    B, k_in, N = x.shape
    assert k_in == k
    x = x.astype(jnp.float32)

    # bf16 weights for the MXU; accumulation stays f32 via preferred_element_type.
    w1b, w2b, w3b = (w.astype(jnp.bfloat16) for w in (w1, w2, w3))
    fw1b, fw2b, fw3b = (w.astype(jnp.bfloat16) for w in (fw1, fw2, fw3))

    # ---------------- Stage 1: conv stack + running max over points ---------
    # Large tiles amortize per-step pipeline overhead; cap at 2048 for v7x's
    # 64 MiB VMEM.  TN == N (no mask) or a multiple of 128 (mask last tile).
    if N <= 2048:
        TN = N
    else:
        TN = 2048
    num_n = pl.cdiv(N, TN)

    conv_kernel = functools.partial(_conv_pool_kernel, tn=TN, n_valid=N)
    conv_flops = 2 * B * N * (k * 64 + 64 * 128 + 128 * 1024)
    conv_bytes = (int(x.size) * 4
                  + sum(int(w.size) * 2 for w in (w1b, w2b, w3b))
                  + sum(int(b.size) * 4 for b in (b1, b2))
                  + B * 8 * 1024 * 4)

    pooled = pl.pallas_call(
        conv_kernel,
        out_shape=jax.ShapeDtypeStruct((B, 8, 1024), jnp.float32),
        grid=(B, num_n),
        in_specs=[
            pl.BlockSpec((1, k, TN), lambda b, n: (b, 0, n)),
            pl.BlockSpec(w1b.shape, lambda b, n: (0, 0)),
            pl.BlockSpec(b1.shape, lambda b, n: (0, 0)),
            pl.BlockSpec(w2b.shape, lambda b, n: (0, 0)),
            pl.BlockSpec(b2.shape, lambda b, n: (0, 0)),
            pl.BlockSpec(w3b.shape, lambda b, n: (0, 0)),
        ],
        out_specs=pl.BlockSpec((1, 8, 1024), lambda b, n: (b, 0, 0)),
        compiler_params=pltpu.CompilerParams(
            dimension_semantics=("parallel", "arbitrary"),
            vmem_limit_bytes=48 * 1024 * 1024),
        cost_estimate=pl.CostEstimate(flops=conv_flops, transcendentals=0,
                                      bytes_accessed=conv_bytes),
    )(x, w1b, b1, w2b, b2, w3b)

    # ---------------- Stage 2: batched FC stack (identity folded into fb3) --
    kk = k * k
    fb3_eff = (fb3 + jnp.eye(k, dtype=jnp.float32).reshape(1, kk)).astype(jnp.float32)

    TB = min(B, 256)
    num_b = pl.cdiv(B, TB)
    b_pad = num_b * TB
    pooled_p = pooled if b_pad == B else jnp.pad(
        pooled, ((0, b_pad - B), (0, 0), (0, 0)))

    out_flat = pl.pallas_call(
        _fc_kernel,
        out_shape=jax.ShapeDtypeStruct((b_pad, kk), jnp.float32),
        grid=(num_b,),
        in_specs=[
            pl.BlockSpec((TB, 8, 1024), lambda i: (i, 0, 0)),
            pl.BlockSpec(b3.shape, lambda i: (0, 0)),
            pl.BlockSpec(fw1b.shape, lambda i: (0, 0)),
            pl.BlockSpec(fb1.shape, lambda i: (0, 0)),
            pl.BlockSpec(fw2b.shape, lambda i: (0, 0)),
            pl.BlockSpec(fb2.shape, lambda i: (0, 0)),
            pl.BlockSpec(fw3b.shape, lambda i: (0, 0)),
            pl.BlockSpec(fb3_eff.shape, lambda i: (0, 0)),
        ],
        out_specs=pl.BlockSpec((TB, kk), lambda i: (i, 0)),
        compiler_params=pltpu.CompilerParams(
            dimension_semantics=("parallel",),
            vmem_limit_bytes=48 * 1024 * 1024),
    )(pooled_p, b3, fw1b, fb1, fw2b, fb2, fw3b, fb3_eff)

    return out_flat[:B].reshape(B, k, k)


def stnkd_reference(x, params, k):
    """Plain-JAX reference with identical semantics (folded BN, bf16 matmul
    inputs with f32 accumulation)."""
    (w1, b1, w2, b2, w3, b3, fw1, fb1, fw2, fb2, fw3, fb3) = params

    def mm(a, w):
        return jnp.dot(a.astype(jnp.bfloat16), w.astype(jnp.bfloat16),
                       preferred_element_type=jnp.float32)

    xt = jnp.transpose(x, (0, 2, 1)).astype(jnp.float32)       # (B, N, k)
    h = jnp.maximum(mm(xt, w1) + b1, 0.0)
    h = jnp.maximum(mm(h, w2) + b2, 0.0)
    h = jnp.maximum(mm(h, w3) + b3, 0.0)
    g = jnp.max(h, axis=1)                                     # (B, 1024)
    g = jnp.maximum(mm(g, fw1) + fb1, 0.0)
    g = jnp.maximum(mm(g, fw2) + fb2, 0.0)
    g = mm(g, fw3) + fb3
    g = g + jnp.eye(k, dtype=jnp.float32).reshape(1, k * k)
    return g.reshape(-1, k, k)


if __name__ == "__main__":
    key = jax.random.PRNGKey(0)
    k = 4          # STNkd's k
    B = 2          # batch
    N = 16         # number of points (Conv1d spatial/width dim)

    k_params, k_x = jax.random.split(key)
    params = init_params(k_params, k)
    x = jax.random.normal(k_x, (B, k, N), dtype=jnp.float32)   # NCW like torch

    out = stnkd_forward(x, params, k)
    out = jax.block_until_ready(out)

    ref = stnkd_reference(x, params, k)
    assert out.shape == (B, k, k)
    assert jnp.allclose(out, ref, atol=1e-3, rtol=1e-3), "mismatch vs reference"

    print("KERNEL_OK")
</pallas_src>

<mosaic_0001>
module attributes {stable_mosaic.version = 11 : i64} {
  func.func @_conv_pool_kernel(%arg0: i32, %arg1: i32, %arg2: memref<1x4x16xf32, #tpu.memory_space<vmem>>, %arg3: memref<4x64xbf16, #tpu.memory_space<vmem>>, %arg4: memref<1x64xf32, #tpu.memory_space<vmem>>, %arg5: memref<64x128xbf16, #tpu.memory_space<vmem>>, %arg6: memref<1x128xf32, #tpu.memory_space<vmem>>, %arg7: memref<128x1024xbf16, #tpu.memory_space<vmem>>, %arg8: memref<1x8x1024xf32, #tpu.memory_space<vmem>>) attributes {dimension_semantics = [#tpu.dimension_semantics<parallel>, #tpu.dimension_semantics<arbitrary>], iteration_bounds = array<i64: 2, 1>, scalar_prefetch = 0 : i64, scratch_operands = 0 : i64, tpu.core_type = #tpu.core_type<tc>, window_params = [{transform_indices = @transform_0, window_bounds = array<i64: 1, 4, 16>}, {pipeline_mode = #tpu.pipeline_mode<synchronous>, transform_indices = @transform_1, window_bounds = array<i64: 4, 64>}, {pipeline_mode = #tpu.pipeline_mode<synchronous>, transform_indices = @transform_2, window_bounds = array<i64: 1, 64>}, {pipeline_mode = #tpu.pipeline_mode<synchronous>, transform_indices = @transform_3, window_bounds = array<i64: 64, 128>}, {pipeline_mode = #tpu.pipeline_mode<synchronous>, transform_indices = @transform_4, window_bounds = array<i64: 1, 128>}, {pipeline_mode = #tpu.pipeline_mode<synchronous>, transform_indices = @transform_5, window_bounds = array<i64: 128, 1024>}, {transform_indices = @transform_6, window_bounds = array<i64: 1, 8, 1024>}]} {
    %c0_i32 = arith.constant 0 : i32
    %0 = arith.cmpi eq, %arg1, %c0_i32 : i32
    %1 = arith.extui %0 : i1 to i32
    %c0_i32_0 = arith.constant 0 : i32
    %2 = arith.cmpi ne, %1, %c0_i32_0 : i32
    scf.if %2 {
      %cst_24 = arith.constant 0xFF800000 : f32
      %32 = vector.broadcast %cst_24 : f32 to vector<1x8x1024xf32>
      %c0_25 = arith.constant 0 : index
      %c0_26 = arith.constant 0 : index
      %c0_27 = arith.constant 0 : index
      %33 = vector.load %arg8[%c0_25, %c0_26, %c0_27] : memref<1x8x1024xf32, #tpu.memory_space<vmem>>, vector<1x8x1024xf32>
      tpu.vector_store %arg8[%c0_25, %c0_26, %c0_27], %32 {strides = array<i32>} : memref<1x8x1024xf32, #tpu.memory_space<vmem>>, vector<1x8x1024xf32>,
    } else {
    }
    %c0 = arith.constant 0 : index
    %c0_1 = arith.constant 0 : index
    %c0_2 = arith.constant 0 : index
    %3 = vector.load %arg2[%c0, %c0_1, %c0_2] : memref<1x4x16xf32, #tpu.memory_space<vmem>>, vector<1x4x16xf32>
    %4 = vector.shape_cast %3 : vector<1x4x16xf32> to vector<4x16xf32>
    %5 = arith.truncf %4 : vector<4x16xf32> to vector<4x16xbf16>
    %c0_3 = arith.constant 0 : index
    %c0_4 = arith.constant 0 : index
    %6 = vector.load %arg3[%c0_3, %c0_4] : memref<4x64xbf16, #tpu.memory_space<vmem>>, vector<4x64xbf16>
    %cst = arith.constant dense<0.000000e+00> : vector<16x64xf32>
    %7 = tpu.matmul %5, %6, %cst {dimension_numbers = #tpu.dot_dimension_numbers<[0], [0], [1], [1], [0, 1, 1, 1], [], []>} : vector<4x16xbf16>, vector<4x64xbf16>, vector<16x64xf32> -> vector<16x64xf32>
    %c0_5 = arith.constant 0 : index
    %c0_6 = arith.constant 0 : index
    %8 = vector.load %arg4[%c0_5, %c0_6] : memref<1x64xf32, #tpu.memory_space<vmem>>, vector<1x64xf32>
    %9 = vector.broadcast %8 : vector<1x64xf32> to vector<16x64xf32>
    %10 = arith.addf %7, %9 : vector<16x64xf32>
    %cst_7 = arith.constant 0.000000e+00 : f32
    %11 = vector.broadcast %cst_7 : f32 to vector<16x64xf32>
    %12 = arith.maximumf %10, %11 : vector<16x64xf32>
    %13 = arith.truncf %12 : vector<16x64xf32> to vector<16x64xbf16>
    %c0_8 = arith.constant 0 : index
    %c0_9 = arith.constant 0 : index
    %14 = vector.load %arg5[%c0_8, %c0_9] : memref<64x128xbf16, #tpu.memory_space<vmem>>, vector<64x128xbf16>
    %cst_10 = arith.constant dense<0.000000e+00> : vector<16x128xf32>
    %15 = tpu.matmul %13, %14, %cst_10 {dimension_numbers = #tpu.dot_dimension_numbers<[1], [0], [0], [1], [0, 0, 1, 1], [], []>} : vector<16x64xbf16>, vector<64x128xbf16>, vector<16x128xf32> -> vector<16x128xf32>
    %c0_11 = arith.constant 0 : index
    %c0_12 = arith.constant 0 : index
    %16 = vector.load %arg6[%c0_11, %c0_12] : memref<1x128xf32, #tpu.memory_space<vmem>>, vector<1x128xf32>
    %17 = vector.broadcast %16 : vector<1x128xf32> to vector<16x128xf32>
    %18 = arith.addf %15, %17 : vector<16x128xf32>
    %cst_13 = arith.constant 0.000000e+00 : f32
    %19 = vector.broadcast %cst_13 : f32 to vector<16x128xf32>
    %20 = arith.maximumf %18, %19 : vector<16x128xf32>
    %21 = arith.truncf %20 : vector<16x128xf32> to vector<16x128xbf16>
    %c0_14 = arith.constant 0 : index
    %c0_15 = arith.constant 0 : index
    %22 = vector.load %arg7[%c0_14, %c0_15] : memref<128x1024xbf16, #tpu.memory_space<vmem>>, vector<128x1024xbf16>
    %cst_16 = arith.constant dense<0.000000e+00> : vector<16x1024xf32>
    %23 = tpu.matmul %21, %22, %cst_16 {dimension_numbers = #tpu.dot_dimension_numbers<[1], [0], [0], [1], [0, 0, 1, 1], [], []>} : vector<16x128xbf16>, vector<128x1024xbf16>, vector<16x1024xf32> -> vector<16x1024xf32>
    %24 = vector.shape_cast %23 : vector<16x1024xf32> to vector<2x8x1024xf32>
    %cst_17 = arith.constant dense<0xFF800000> : vector<8x1024xf32>
    %25 = vector.multi_reduction <maximumf>, %24, %cst_17 [0] : vector<2x8x1024xf32> to vector<8x1024xf32>
    %c0_18 = arith.constant 0 : index
    %c0_19 = arith.constant 0 : index
    %c0_20 = arith.constant 0 : index
    %26 = vector.load %arg8[%c0_18, %c0_19, %c0_20] : memref<1x8x1024xf32, #tpu.memory_space<vmem>>, vector<1x8x1024xf32>
    %27 = vector.shape_cast %26 : vector<1x8x1024xf32> to vector<8x1024xf32>
    %28 = arith.maximumf %27, %25 : vector<8x1024xf32>
    %c0_21 = arith.constant 0 : index
    %c0_22 = arith.constant 0 : index
    %c0_23 = arith.constant 0 : index
    %29 = vector.load %arg8[%c0_21, %c0_22, %c0_23] : memref<1x8x1024xf32, #tpu.memory_space<vmem>>, vector<1x8x1024xf32>
    %30 = vector.shape_cast %29 : vector<1x8x1024xf32> to vector<8x1024xf32>
    %31 = vector.shape_cast %28 : vector<8x1024xf32> to vector<1x8x1024xf32>
    tpu.vector_store %arg8[%c0_21, %c0_22, %c0_23], %31 {strides = array<i32>} : memref<1x8x1024xf32, #tpu.memory_space<vmem>>, vector<1x8x1024xf32>,
    return
  }
  func.func @transform_0(%arg0: i32, %arg1: i32) -> (i32, i32, i32) {
    %c0_i32 = arith.constant 0 : i32
    %c0_i32_0 = arith.constant 0 : i32
    return %arg0, %c0_i32, %arg1 : i32, i32, i32
  }
  func.func @transform_1(%arg0: i32, %arg1: i32) -> (i32, i32) {
    %c0_i32 = arith.constant 0 : i32
    %c0_i32_0 = arith.constant 0 : i32
    %c0_i32_1 = arith.constant 0 : i32
    return %c0_i32, %c0_i32_0 : i32, i32
  }
  func.func @transform_2(%arg0: i32, %arg1: i32) -> (i32, i32) {
    %c0_i32 = arith.constant 0 : i32
    %c0_i32_0 = arith.constant 0 : i32
    %c0_i32_1 = arith.constant 0 : i32
    return %c0_i32, %c0_i32_0 : i32, i32
  }
  func.func @transform_3(%arg0: i32, %arg1: i32) -> (i32, i32) {
    %c0_i32 = arith.constant 0 : i32
    %c0_i32_0 = arith.constant 0 : i32
    %c0_i32_1 = arith.constant 0 : i32
    return %c0_i32, %c0_i32_0 : i32, i32
  }
  func.func @transform_4(%arg0: i32, %arg1: i32) -> (i32, i32) {
    %c0_i32 = arith.constant 0 : i32
    %c0_i32_0 = arith.constant 0 : i32
    %c0_i32_1 = arith.constant 0 : i32
    return %c0_i32, %c0_i32_0 : i32, i32
  }
  func.func @transform_5(%arg0: i32, %arg1: i32) -> (i32, i32) {
    %c0_i32 = arith.constant 0 : i32
    %c0_i32_0 = arith.constant 0 : i32
    %c0_i32_1 = arith.constant 0 : i32
    return %c0_i32, %c0_i32_0 : i32, i32
  }
  func.func @transform_6(%arg0: i32, %arg1: i32) -> (i32, i32, i32) {
    %c0_i32 = arith.constant 0 : i32
    %c0_i32_0 = arith.constant 0 : i32
    %c0_i32_1 = arith.constant 0 : i32
    return %arg0, %c0_i32, %c0_i32_0 : i32, i32, i32
  }
}

</mosaic_0001>

<bundles_post_ra>
// kernel: tpu_custom_call.1
= control target key start
LH: loop header
LB: loop body
LE: loop exit
PB: predicated region body
PF: predicated region fallthrough
CT: control target
= control target key end

     0   :  { %11 = vsyncpa [#allocation3], 0  ;;  %s1887_s0 = inlined_call_operand.hbm [shape: f32[2,4,16], index: 0, kind: input, shape index: {}]   ;;  %s1888_s1 = inlined_call_operand.vmem [shape: bf16[4,64], index: 1, kind: input, shape index: {}]   ;;  %s1889_s2 = inlined_call_operand.vmem [shape: f32[1,64], index: 2, kind: input, shape index: {}]   ;;  %s1890_s3 = inlined_call_operand.hbm [shape: bf16[64,128], index: 3, kind: input, shape index: {}]   ;;  %s1891_s4 = inlined_call_operand.vmem [shape: f32[1,128], index: 4, kind: input, shape index: {}]   ;;  %s1892_s5 = inlined_call_operand.hbm [shape: bf16[128,1024], index: 5, kind: input, shape index: {}]   ;;  %s1893_s6 = inlined_call_operand.hbm [shape: f32[2,8,1024], index: 6, kind: output, shape index: {}]  }
   0x1   :  { %13 = vsyncpa [#allocation3 + $0x1], 0 }
   0x2   :  { %14 = vsyncpa [#allocation6], 0 }
   0x3   :  { %15 = vsyncpa [#allocation4], 0 }
   0x4   :  { %17 = vsyncpa [#allocation4 + $0x1], 0  ;;  %s1621_s21 = smov 0   ;;  %s1623_s22 = smov 0  }
   0x5   :  { %s1625_s23 = smov 0   ;;  %s1627_s24 = smov 0  }
   0x6   :  { %s1629_s25 = smov 0   ;;  %s1631_s26 = smov 0  }
   0x7 LB: > { %s1190_s27 = sadd.s32 4294967295, %s1573_s26   ;;  %s1191_s28 = sadd.s32 4294967294, %s1573_s26   ;;  %s1573_s26 = sphi %s1631_s26, %s23_s26   ;;  %s1569_s25 = sphi %s1629_s25, %s1918_s25   ;;  %s1565_s24 = sphi %s1627_s24, %s1917_s24   ;;  %s1561_s23 = sphi %s1625_s23, %s1916_s23   ;;  %s1557_s22 = sphi %s1623_s22, %s1915_s22   ;;  %s1553_s21 = sphi %s1621_s21, %s1914_s21  }
   0x8   : > { %p57_p0 = scmp.ne.s32.totalorder %s1557_s22, %s1553_s21  ;;  %p1655_p1 = scmp.eq.s32.totalorder %s1190_s27, 0 }
   0x9   : > { %p1659_p2 = scmp.eq.s32.totalorder %s1190_s27, 1  ;;  %p192_p3 = scmp.eq.s32.totalorder %s1191_s28, 1 }
   0xa   : > { %s1899_s29 = scalar_select %p1655_p1, 1, 0 }
   0xb   : > { %p1665_p4 = por %p1655_p1, %p57_p0  ;;  %p1192_p5 = scmp.ge.s32.totalorder %s1573_s26, 1 }
   0xc   : > { %p1670_p6 = por %p192_p3, %p57_p0  ;;  %p199_p7 = scmp.lt.s32.totalorder %s1573_s26, 3 }
   0xd   : > { %s1901_s7 = scalar_select %p1665_p4, 1, 0 }
   0xe   : > { %s1902_s8 = scalar_select %p1670_p6, 1, 0 }
   0xf   : > { %p1675_p8 = pnand %p1192_p5, %p199_p7  ;;  %s1575_s10 = smov [#allocation5]  }
  0x10   : > { %1903 = sst [smem:[#allocation12_spill]] %s1902_s8  ;;  %s217_s11 = sshll.u32 %s1575_s10, 4  ;;  %s1679_s11 = int_to_ptr.vmem [resolvable:$true] %s217_s11 }
  0x11   : > { %p1318_p9 = pneg %p1675_p8  ;;  %s1576_s13 = smov [#allocation7]  }
  0x12   : > { %s233_s14 = sshll.u32 %s1576_s13, 4  ;;  %s1401_s17 = scalar_lea.hbm %s1890_s3, 512  ;;  %s1690_s14 = int_to_ptr.vmem [resolvable:$true] %s233_s14 }
  0x13   : > { %p1686_p11 = pnand %p1318_p9, %p1655_p1  ;;  %p1402_p12 = scmp.ne.s32.totalorder %s1890_s3, %s1401_s17 }
  0x14   : > { %p1408_p5 = scmp.lt.u32.totalorder %s1401_s17, %s1890_s3 }
  0x15   : > { %p1403_p13 = pneg %p1686_p11 }
  0x17   : > { %p1404_p0 = pnand %p1403_p13, %p1402_p12 }
  0x19   : > { %p1405_p3 = pneg %p1404_p0 }
  0x1b   : > { %p1410_p7 = pnand %p1408_p5, %p1405_p3 }
  0x1d   : > { %1413 = shalt.err (!%p1410_p7)
}
  0x1e   : > { %s1414_s28 = scalar_lea.vmem %s1679_s11, 512  ;;  %p1422_p1 = scmp.lt.s32.totalorder %s1679_s11, %s1679_s11 }
  0x1f   : > { %p1415_p9 = scmp.ne.s32.totalorder %s1679_s11, %s1414_s28  ;;  %p1423_p12 = scmp.lt.s32.totalorder %s1414_s28, %s1414_s28 }
  0x21   : > { %p1417_p10 = pnand %p1415_p9, %p1403_p13  ;;  %p1424_p0 = por %p1423_p12, %p1422_p1 }
  0x23   : > { %p1418_p6 = pneg %p1417_p10 }
  0x25   : > { %p1425_p4 = pnand %p1424_p0, %p1418_p6 }
  0x27   : > { %1428 = shalt.err (!%p1425_p4)
}
  0x28   : > { %s1577_s10 = smov 64   ;;  %s1578_s13 = smov 4  }
  0x29   : > { %1321 = dma.hbm_to_vmem [thread:$0]  (!%p1686_p11), %s1890_s3, 512, %s1679_s11, [#allocation6], %s1577_s10, %s1577_s10, %s1578_s13  }
  0x2a   : > { %s1429_s19 = scalar_lea.hbm %s1892_s5, 8192 }
  0x2b   : > { %p1430_p1 = scmp.ne.s32.totalorder %s1892_s5, %s1429_s19  ;;  %p1436_p10 = scmp.lt.u32.totalorder %s1429_s19, %s1892_s5 }
  0x2d   : > { %p1432_p4 = pnand %p1430_p1, %p1403_p13 }
  0x2f   : > { %p1433_p6 = pneg %p1432_p4 }
  0x31   : > { %p1438_p3 = pnand %p1436_p10, %p1433_p6 }
  0x33   : > { %1441 = shalt.err (!%p1438_p3)
}
  0x34   : > { %s1442_s11 = scalar_lea.vmem %s1690_s14, 8192  ;;  %p1450_p12 = scmp.lt.s32.totalorder %s1690_s14, %s1690_s14 }
  0x35   : > { %p1443_p5 = scmp.ne.s32.totalorder %s1690_s14, %s1442_s11  ;;  %p1451_p0 = scmp.lt.s32.totalorder %s1442_s11, %s1442_s11 }
  0x37   : > { %p1445_p7 = pnand %p1443_p5, %p1403_p13  ;;  %p1452_p1 = por %p1451_p0, %p1450_p12 }
  0x39   : > { %p1446_p9 = pneg %p1445_p7 }
  0x3b   : > { %p1453_p4 = pnand %p1452_p1, %p1446_p9 }
  0x3d   : > { %1456 = shalt.err (!%p1453_p4)
}
  0x3e   : > { %s1579_s8 = smov 512   ;;  %s1580_s10 = smov 32  }
  0x3f   : > { %1324 = dma.hbm_to_vmem [thread:$0]  (!%p1686_p11), %s1892_s5, 8192, %s1690_s14, [#allocation6], %s1579_s8, %s1579_s8, %s1580_s10  }
  0x40   : > { %s35_s16 = sadd.s32 1, %s1569_s25  ;;  %s44_s17 = sadd.s32 1, %s1561_s23 }
  0x41   : > { %p37_p13 = scmp.ge.s32.totalorder %s35_s16, 2  ;;  %p51_p6 = scmp.ne.s32.totalorder %s1561_s23, %s1557_s22 }
  0x42   : > { %p52_p10 = scmp.eq.s32.totalorder %s1573_s26, 0  ;;  %p1335_p3 = scmp.lt.s32.totalorder %s1573_s26, 2 }
  0x43   : > { %s1920_s16 = smov (%p37_p13, %s35_s16), 0  ;;  %p1754_p7 = por %p1659_p2, %p51_p6 }
  0x44   : > { %p53_p5 = por %p52_p10, %p51_p6  ;;  %s39_s12 = ssub.s32 %s1569_s25, %s1920_s16 }
  0x45   : > { %s1906_s18 = scalar_select %p1754_p7, 1, 0 }
  0x46   : > { %s247_s19 = sand.u32 1, %s1561_s23   ;;  %p42_p9 = scmp.eq.s32.totalorder %s39_s12, 0 }
  0x47   : > { %s1196_s14 = sshll.u32 %s247_s19, 2  ;;  %s1197_s20 = sshll.u32 %s1569_s25, 6 }
  0x48   : > { %s1763_s27 = scalar_select %p42_p9, %s1561_s23, %s44_s17  }
  0x49   : > { %s1768_s8 = scalar_lea.hbm %s1887_s0, %s1197_s20  ;;  %s251_s30 = scalar_lea.vmem [#allocation2], %s1196_s14 }
  0x4a   : > { %s259_s10 = sshll.u32 %s251_s30, 4  ;;  %p1772_p2 = pnand %p1335_p3, %p53_p5  ;;  %s1776_s10 = int_to_ptr.vmem [resolvable:$true] %s259_s10 }
  0x4b   : > { %s248_s15 = scalar_lea.sflag [#allocation3], %s247_s19  ;;  %s1457_s17 = scalar_lea.hbm %s1768_s8, 64 }
  0x4c   : > { %p1458_p11 = scmp.ne.s32.totalorder %s1768_s8, %s1457_s17  ;;  %p1459_p12 = pneg %p1772_p2 }
  0x4d   : > { %s1462_s20 = scalar_lea.hbm %s1887_s0, 128  ;;  %p1463_p4 = scmp.lt.u32.totalorder %s1768_s8, %s1887_s0 }
  0x4e   : > { %p1460_p0 = pnand %p1459_p12, %p1458_p11  ;;  %p1464_p13 = scmp.lt.u32.totalorder %s1462_s20, %s1457_s17 }
  0x4f   : > { %p1466_p10 = scmp.lt.u32.totalorder %s1457_s17, %s1768_s8 }
  0x50   : > { %p1461_p1 = pneg %p1460_p0  ;;  %p1465_p6 = por %p1464_p13, %p1463_p4 }
  0x52   : > { %p1467_p3 = por %p1466_p10, %p1465_p6 }
  0x54   : > { %p1468_p5 = pnand %p1467_p3, %p1461_p1 }
  0x56   : > { %1471 = shalt.err (!%p1468_p5)
}
  0x57   : > { %s1472_s19 = scalar_lea.vmem %s1776_s10, 64  ;;  %s1581_s30 = smov [#allocation2]  }
  0x58   : > { %p1473_p9 = scmp.ne.s32.totalorder %s1776_s10, %s1472_s19  ;;  %s1477_s12 = sshll.u32 %s1581_s30, 4  ;;  %s1478_s12 = int_to_ptr.vmem [resolvable:$false] %s1477_s12 }
  0x59   : > { %s1479_s14 = scalar_lea.vmem %s1478_s12, 128  ;;  %p1480_p7 = scmp.lt.s32.totalorder %s1776_s10, %s1478_s12 }
  0x5a   : > { %p1475_p11 = pnand %p1473_p9, %p1459_p12  ;;  %p1481_p4 = scmp.lt.s32.totalorder %s1479_s14, %s1472_s19 }
  0x5c   : > { %p1476_p0 = pneg %p1475_p11  ;;  %p1482_p13 = por %p1481_p4, %p1480_p7 }
  0x5e   : > { %p1483_p6 = pnand %p1482_p13, %p1476_p0 }
  0x60   : > { %1486 = shalt.err (!%p1483_p6)
}
  0x61   : > { %1328 = dma.hbm_to_vmem [thread:$0]  (!%p1772_p2), %s1768_s8, 64, %s1776_s10, %s248_s15  }
  0x62   : > { %268 = sbr.rel (%p1675_p8) target bundleno = 919 (0x397), region = 44  ;;  %s1806_s17 = sand.u32 (!%p1675_p8), 1, %s1557_s22  }
  0x63   : > { %s1199_s20 = sshll.u32 (!%p1675_p8), %s1806_s17, 2  ;;  %s271_s28 = scalar_lea.sflag (!%p1675_p8), [#allocation3], %s1806_s17 }
  0x64   : > { %s274_s11 = scalar_lea.vmem (!%p1675_p8), [#allocation2], %s1199_s20  ;;  %p1908_p7 = scmp.ne.s32.totalorder (!%p1675_p8), %s1901_s7, 0 }
  0x69   : > { %1540 = dma.done.wait (%p1908_p7), %s271_s28, 64  }
  0x6a   : > { %1542 = vsyncadd (%p1908_p7), %s271_s28, 4294967232  ;;  %p1909_p12 = scmp.ne.s32.totalorder %s1899_s29, 0 }
  0x6c   : > { %1544 = dma.done.wait (%p1909_p12), [#allocation6], 8704  }
  0x6d   : > { %1546 = vsyncadd (%p1909_p12), [#allocation6], 4294958592  ;;  %v1582_v0 = vmov 0.0   ;;  %vm1583_vm0 = vmmov 0   ;;  %vm354_vm1 = vcmask 1041408   ;;  %v1397_v5 = vld [vmem:[#allocation5] sm:$0xff]  }
  0x6e   : > { %1288 = vmatprep.subr.bf16.mxu0 %v1582_v0  ;;  %1290 = vmatprep.mubr.msk.bf16.mxu0 %vm1583_vm0, %v1582_v0  ;;  %v324_v1 = vld [vmem:[%s274_s11] sm:$0xf]  ;;  %v1398_v6 = vld [vmem:[#allocation5 + $0x8] sm:$0xff]   ;;  %vm350_vm2 = vcmask 31744   ;;  %v1399_v8 = vld [vmem:[#allocation5 + $0x10] sm:$0xff]   ;;  %vm441_vm3 = vcmask 523264  }
  0x6f   : > { %1294 = vmatprep.subr.bf16.mxu1 %v1582_v0  ;;  %1302 = vmatprep.mubr.msk.bf16.mxu1 %vm1583_vm0, %v1582_v0  ;;  %v326_v2 = vld [vmem:[%s1888_s1] sm:$0x3]  ;;  %v325_v3 = vpack.c.bf16 %v324_v1, %v324_v1  ;;  %v489_v10 = vld [vmem:[#allocation7] sm:$0xff]  ;;  %v490_v12 = vld [vmem:[#allocation7 + $0x8] sm:$0xff]  ;;  %s1202_s15 = sshll.u32 %s1806_s17, 6  ;;  %s1280_s30 = sshll.u32 %s1565_s24, 10 }
  0x70   : > { %v356_v4 = vsel %vm354_vm1, %v326_v2, 0  ;;  %1295 = vmatpush3.bf16.msra.mxu1 %v1397_v5  ;;  %v1400_v9 = vld [vmem:[#allocation5 + $0x18] sm:$0xff]   ;;  %v493_v11 = vld [vmem:[#allocation7 + $0x20] sm:$0xff]  ;;  %v494_v15 = vld [vmem:[#allocation7 + $0x28] sm:$0xff]  ;;  %s310_s19 = scalar_lea.vmem [#allocation8], %s1202_s15  ;;  %s1838_s28 = scalar_lea.hbm %s1893_s6, %s1280_s30 }
  0x71   : > { %1289 = vmatpush3.bf16.msra.mxu0 %v356_v4  ;;  %334 = vxpose.xlu0.c.b16.start.end [1/1] (short) (narrow) %v325_v3, 16  ;;  %v1211_v13 = vcombine.low %v489_v10, %v493_v11  ;;  %v1212_v14 = vcombine.high %v489_v10, %v493_v11  ;;  %v497_v16 = vld [vmem:[#allocation7 + $0x40] sm:$0xff]  ;;  %v1213_v18 = vcombine.low %v490_v12, %v494_v15  ;;  %v1203_v38 = vld [vmem:[%s1889_s2] ss:$0 sm:$0xff]  ;;  %v498_v45 = vld [vmem:[#allocation7 + $0x48] sm:$0xff]  ;;  %s1092_s12 = sshll.u32 %s310_s19, 4  ;;  %s1840_s12 = int_to_ptr.vmem [resolvable:$true] %s1092_s12 }
  0x72   : > { %1296 = vmatprep.subr.bf16.mxu1 %v1582_v0  ;;  %v501_v17 = vld [vmem:[#allocation7 + $0x60] sm:$0xff]  ;;  %v1214_v19 = vcombine.high %v490_v12, %v494_v15  ;;  %v502_v46 = vld [vmem:[#allocation7 + $0x68] sm:$0xff]  ;;  %s1078_s11 = scalar_lea.sflag [#allocation4], %s1806_s17  ;;  %s1487_s9 = scalar_lea.vmem %s1840_s12, 1024 }
  0x73   : > { %v1220_v20 = vcombine.high %v497_v16, %v501_v17  ;;  %873 = vmatprep.subr.bf16.mxu0 %v1212_v14  ;;  %v1219_v21 = vcombine.low %v497_v16, %v501_v17  ;;  %v505_v22 = vld [vmem:[#allocation7 + $0x80] sm:$0xff]  ;;  %v1222_v50 = vcombine.high %v498_v45, %v502_v46  ;;  %v506_v51 = vld [vmem:[#allocation7 + $0x88] sm:$0xff]  ;;  %v1221_v53 = vcombine.low %v498_v45, %v502_v46  ;;  %v507_v45 = vld [vmem:[#allocation7 + $0x90] sm:$0xff]  ;;  %p1488_p8 = scmp.ne.s32.totalorder %s1840_s12, %s1487_s9  ;;  %p1910_p2 = scmp.ne.s32.totalorder %s1906_s18, 0 }
  0x74   : > { %1297 = vmatpush3.bf16.msra.mxu1 %v1398_v6  ;;  %v509_v23 = vld [vmem:[#allocation7 + $0xa0] sm:$0xff]  ;;  %v510_v52 = vld [vmem:[#allocation7 + $0xa8] sm:$0xff]  ;;  %v511_v46 = vld [vmem:[#allocation7 + $0xb0] sm:$0xff]  ;;  %s1585_s24 = smov [#allocation8]  }
  0x75   : > { %1298 = vmatprep.subr.bf16.mxu1 %v1582_v0  ;;  %v1228_v24 = vcombine.high %v505_v22, %v509_v23  ;;  %v1227_v25 = vcombine.low %v505_v22, %v509_v23  ;;  %v513_v26 = vld [vmem:[#allocation7 + $0xc0] sm:$0xff]  ;;  %v1230_v54 = vcombine.high %v506_v51, %v510_v52  ;;  %v514_v55 = vld [vmem:[#allocation7 + $0xc8] sm:$0xff]  ;;  %v1229_v57 = vcombine.low %v506_v51, %v510_v52  ;;  %v492_v22 = vld [vmem:[#allocation7 + $0x18] sm:$0xff]  ;;  %p1489_p1 = pnand %p1488_p8, %p1910_p2  ;;  %s1491_s8 = sshll.u32 %s1585_s24, 4  ;;  %s1492_s8 = int_to_ptr.vmem [resolvable:$false] %s1491_s8 }
  0x76   : > { %v517_v27 = vld [vmem:[#allocation7 + $0xe0] sm:$0xff]  ;;  %v518_v56 = vld [vmem:[#allocation7 + $0xe8] sm:$0xff]  ;;  %v1232_v51 = vcombine.high %v507_v45, %v511_v46  ;;  %s1493_s29 = scalar_lea.vmem %s1492_s8, 2048  ;;  %p1494_p3 = scmp.lt.s32.totalorder %s1840_s12, %s1492_s8 }
  0x77   : > { %v1236_v28 = vcombine.high %v513_v26, %v517_v27  ;;  %v1235_v29 = vcombine.low %v513_v26, %v517_v27  ;;  %v521_v30 = vld [vmem:[#allocation7 + $0x100] sm:$0xff]  ;;  %v1238_v58 = vcombine.high %v514_v55, %v518_v56  ;;  %v522_v59 = vld [vmem:[#allocation7 + $0x108] sm:$0xff]  ;;  %v1237_v61 = vcombine.low %v514_v55, %v518_v56  ;;  %v516_v55 = vld [vmem:[#allocation7 + $0xd8] sm:$0xff]  ;;  %p1490_p10 = pneg %p1489_p1  ;;  %p1495_p5 = scmp.lt.s32.totalorder %s1493_s29, %s1487_s9 }
  0x78   : > { %1299 = vmatpush3.bf16.msra.mxu1 %v1399_v8  ;;  %v525_v31 = vld [vmem:[#allocation7 + $0x120] sm:$0xff]  ;;  %v526_v60 = vld [vmem:[#allocation7 + $0x128] sm:$0xff]  ;;  %v520_v56 = vld [vmem:[#allocation7 + $0xf8] sm:$0xff] }
  0x79   : > { %1300 = vmatprep.subr.bf16.mxu1 %v1582_v0  ;;  %v1244_v32 = vcombine.high %v521_v30, %v525_v31  ;;  %v1243_v33 = vcombine.low %v521_v30, %v525_v31  ;;  %v529_v34 = vld [vmem:[#allocation7 + $0x140] sm:$0xff]  ;;  %v1246_v62 = vcombine.high %v522_v59, %v526_v60  ;;  %v530_v63 = vld [vmem:[#allocation7 + $0x148] sm:$0xff]  ;;  %v1245_v1 = vcombine.low %v522_v59, %v526_v60  ;;  %p1496_p9 = por %p1495_p5, %p1494_p3 }
  0x7a   : > { %v533_v35 = vld [vmem:[#allocation7 + $0x160] sm:$0xff]  ;;  %v534_v0 = vld [vmem:[#allocation7 + $0x168] sm:$0xff]  ;;  %v1242_v60 = vcombine.high %v516_v55, %v520_v56 }
  0x7b   : > { %v1252_v36 = vcombine.high %v529_v34, %v533_v35  ;;  %v1251_v37 = vcombine.low %v529_v34, %v533_v35  ;;  %v1254_v2 = vcombine.high %v530_v63, %v534_v0  ;;  %v1253_v3 = vcombine.low %v530_v63, %v534_v0  ;;  %v537_v4 = vld [vmem:[#allocation7 + $0x180] sm:$0xff]  ;;  %v538_v6 = vld [vmem:[#allocation7 + $0x188] sm:$0xff]  ;;  %v524_v63 = vld [vmem:[#allocation7 + $0x118] sm:$0xff]  ;;  %p1497_p11 = pnand %p1496_p9, %p1490_p10 }
  0x7c   : > { %1301 = vmatpush3.bf16.msra.mxu1 %v1400_v9  ;;  %v541_v5 = vld [vmem:[#allocation7 + $0x1a0] sm:$0xff]  ;;  %v542_v8 = vld [vmem:[#allocation7 + $0x1a8] sm:$0xff]  ;;  %v528_v0 = vld [vmem:[#allocation7 + $0x138] sm:$0xff] }
  0x7d   : > { %916 = vmatprep.subr.bf16.mxu1 %v1214_v19  ;;  %v1259_v9 = vcombine.low %v537_v4, %v541_v5  ;;  %v1261_v10 = vcombine.low %v538_v6, %v542_v8  ;;  %v1262_v11 = vcombine.high %v538_v6, %v542_v8  ;;  %v545_v12 = vld [vmem:[#allocation7 + $0x1c0] sm:$0xff]  ;;  %v546_v14 = vld [vmem:[#allocation7 + $0x1c8] sm:$0xff]  ;;  %v535_v6 = vld [vmem:[#allocation7 + $0x170] sm:$0xff] }
  0x7e   : > { %v550_v16 = vld [vmem:[#allocation7 + $0x1e8] sm:$0xff]  ;;  %v536_v8 = vld [vmem:[#allocation7 + $0x178] sm:$0xff] }
  0x7f   : > { %v1270_v19 = vcombine.high %v546_v14, %v550_v16 }
  0xd7   : > { %v342_v7 = vpop.trf.xlu0 }
  0xd8   : > { %1291 = vmatmul.mubr.msk.bf16.vlgmr.msra.gmra.mrb[0].mxu0 %vm350_vm2, %v342_v7  ;;  %v1260_v7 = vcombine.high %v537_v4, %v541_v5  ;;  %v1250_v4 = vcombine.high %v524_v63, %v528_v0  ;;  %v531_v5 = vld [vmem:[#allocation7 + $0x150] sm:$0xff] }
  0xd9   : > { %874 = vmatpush1.bf16.msra.mxu0 %v1211_v13  ;;  %v549_v13 = vld [vmem:[#allocation7 + $0x1e0] sm:$0xff] }
  0xda   : > { %875 = vmatprep.subr.bf16.mxu0 %v1220_v20  ;;  %v1268_v15 = vcombine.high %v545_v12, %v549_v13  ;;  %v1267_v17 = vcombine.low %v545_v12, %v549_v13  ;;  %v491_v20 = vld [vmem:[#allocation7 + $0x10] sm:$0xff] }
  0xdb   : > { %v539_v13 = vld [vmem:[#allocation7 + $0x190] sm:$0xff] }
  0xdd   : > { %876 = vmatpush1.bf16.msra.mxu0 %v1219_v21  ;;  %v495_v21 = vld [vmem:[#allocation7 + $0x30] sm:$0xff] }
  0xde   : > { %877 = vmatprep.subr.bf16.mxu0 %v1228_v24  ;;  %v1216_v23 = vcombine.high %v491_v20, %v495_v21  ;;  %v496_v24 = vld [vmem:[#allocation7 + $0x38] sm:$0xff] }
  0xdf   : > { %v1217_v26 = vcombine.low %v492_v22, %v496_v24  ;;  %v1218_v27 = vcombine.high %v492_v22, %v496_v24  ;;  %v551_v22 = vld [vmem:[#allocation7 + $0x1f0] sm:$0xff]  ;;  %v552_v24 = vld [vmem:[#allocation7 + $0x1f8] sm:$0xff] }
  0xe1   : > { %878 = vmatpush1.bf16.msra.mxu0 %v1227_v25  ;;  %v1215_v25 = vcombine.low %v491_v20, %v495_v21  ;;  %v547_v21 = vld [vmem:[#allocation7 + $0x1d0] sm:$0xff] }
  0xe2   : > { %879 = vmatprep.subr.bf16.mxu0 %v1236_v28  ;;  %v1584_v28 = vmov 0  }
  0xe3   : > { %905 = vmatprep.mubr.bf16.mxu0 %v1584_v28 }
  0xe5   : > { %880 = vmatpush1.bf16.msra.mxu0 %v1235_v29  ;;  %v1205_v29 = vld [vmem:[%s1891_s4] ss:$0 sm:$0xff] }
  0xe6   : > { %881 = vmatprep.subr.bf16.mxu0 %v1244_v32 }
  0xe9   : > { %882 = vmatpush1.bf16.msra.mxu0 %v1243_v33 }
  0xea   : > { %883 = vmatprep.subr.bf16.mxu0 %v1252_v36  ;;  %v499_v36 = vld [vmem:[#allocation7 + $0x50] sm:$0xff] }
  0xed   : > { %884 = vmatpush1.bf16.msra.mxu0 %v1251_v37  ;;  %v503_v37 = vld [vmem:[#allocation7 + $0x70] sm:$0xff] }
  0xee   : > { %885 = vmatprep.subr.bf16.mxu0 %v1260_v7  ;;  %v532_v7 = vld [vmem:[#allocation7 + $0x158] sm:$0xff] }
  0xef   : > { %v1258_v12 = vcombine.high %v532_v7, %v536_v8 }
  0xf1   : > { %886 = vmatpush1.bf16.msra.mxu0 %v1259_v9 }
  0xf2   : > { %887 = vmatprep.subr.bf16.mxu0 %v1268_v15  ;;  %v540_v15 = vld [vmem:[#allocation7 + $0x198] sm:$0xff] }
  0xf5   : > { %888 = vmatpush1.bf16.msra.mxu0 %v1267_v17  ;;  %v1255_v17 = vcombine.low %v531_v5, %v535_v6 }
  0xf6   : > { %959 = vmatprep.subr.bf16.mxu0 %v1216_v23  ;;  %v548_v23 = vld [vmem:[#allocation7 + $0x1d8] sm:$0xff] }
 0x1ab   : > { %v392_v39 = vpop.f32.mrb[0].mxu0 }
 0x1ac   : > { %v393_v40 = vadd.f32 %v1203_v38, %v392_v39  ;;  %v1292_v41 = vpop.f32.mrb[1].mxu0  ;;  %v504_v39 = vld [vmem:[#allocation7 + $0x78] sm:$0xff] }
 0x1ad   : > { %v395_v42 = vpop.f32.mrb[2].mxu0 }
 0x1ae   : > { %v396_v43 = vadd.f32 %v1203_v38, %v395_v42  ;;  %v1293_v44 = vpop.f32.mrb[3].mxu0  ;;  %v399_v47 = vmax.f32 %v393_v40, 0.0  ;;  %v500_v38 = vld [vmem:[#allocation7 + $0x58] sm:$0xff] }
 0x1af   : > { %v1226_v44 = vcombine.high %v500_v38, %v504_v39 }
 0x1b0   : > { %v400_v48 = vmax.f32 %v396_v43, 0.0  ;;  %v1224_v43 = vcombine.high %v499_v36, %v503_v37 }
 0x1b2   : > { %v401_v49 = vpack.c.bf16 %v400_v48, %v399_v47  ;;  %v508_v47 = vld [vmem:[#allocation7 + $0x98] sm:$0xff] }
 0x1b3   : > { %v512_v48 = vld [vmem:[#allocation7 + $0xb8] sm:$0xff] }
 0x1b4   : > { %1303 = vmatmul.mubr.msk.bf16.vlgmr.msra.gmra.mrb[0].mxu1 %vm441_vm3, %v401_v49  ;;  %v1223_v49 = vcombine.low %v499_v36, %v503_v37  ;;  %v1234_v52 = vcombine.high %v508_v47, %v512_v48 }
 0x1b5   : > { %917 = vmatpush1.bf16.msra.mxu1 %v1213_v18  ;;  %v1269_v18 = vcombine.low %v546_v14, %v550_v16  ;;  %948 = vmatprep.mubr.bf16.mxu1 %v1584_v28  ;;  %v543_v14 = vld [vmem:[#allocation7 + $0x1b0] sm:$0xff]  ;;  %v544_v16 = vld [vmem:[#allocation7 + $0x1b8] sm:$0xff] }
 0x1b6   : > { %918 = vmatprep.subr.bf16.mxu1 %v1222_v50  ;;  %v1225_v50 = vcombine.low %v500_v38, %v504_v39  ;;  %v1266_v20 = vcombine.high %v540_v15, %v544_v16 }
 0x1b9   : > { %919 = vmatpush1.bf16.msra.mxu1 %v1221_v53  ;;  %v515_v53 = vld [vmem:[#allocation7 + $0xd0] sm:$0xff] }
 0x1ba   : > { %920 = vmatprep.subr.bf16.mxu1 %v1230_v54  ;;  %v519_v54 = vld [vmem:[#allocation7 + $0xf0] sm:$0xff] }
 0x1bb   : > { %v1240_v59 = vcombine.high %v515_v53, %v519_v54 }
 0x1bd   : > { %921 = vmatpush1.bf16.msra.mxu1 %v1229_v57  ;;  %v1231_v57 = vcombine.low %v507_v45, %v511_v46 }
 0x1be   : > { %922 = vmatprep.subr.bf16.mxu1 %v1238_v58  ;;  %v1233_v58 = vcombine.low %v508_v47, %v512_v48 }
 0x1c1   : > { %923 = vmatpush1.bf16.msra.mxu1 %v1237_v61  ;;  %v523_v61 = vld [vmem:[#allocation7 + $0x110] sm:$0xff] }
 0x1c2   : > { %924 = vmatprep.subr.bf16.mxu1 %v1246_v62  ;;  %v527_v62 = vld [vmem:[#allocation7 + $0x130] sm:$0xff] }
 0x1c3   : > { %v1247_v9 = vcombine.low %v523_v61, %v527_v62 }
 0x1c5   : > { %925 = vmatpush1.bf16.msra.mxu1 %v1245_v1  ;;  %v1239_v1 = vcombine.low %v515_v53, %v519_v54 }
 0x1c6   : > { %926 = vmatprep.subr.bf16.mxu1 %v1254_v2  ;;  %v1241_v2 = vcombine.low %v516_v55, %v520_v56 }
 0x1c9   : > { %927 = vmatpush1.bf16.msra.mxu1 %v1253_v3  ;;  %v1248_v3 = vcombine.high %v523_v61, %v527_v62 }
 0x1ca   : > { %928 = vmatprep.subr.bf16.mxu1 %v1262_v11  ;;  %v1256_v11 = vcombine.high %v531_v5, %v535_v6 }
 0x1cd   : > { %929 = vmatpush1.bf16.msra.mxu1 %v1261_v10  ;;  %v1249_v10 = vcombine.low %v524_v63, %v528_v0 }
 0x1ce   : > { %930 = vmatprep.subr.bf16.mxu1 %v1270_v19  ;;  %v1264_v19 = vcombine.high %v539_v13, %v543_v14 }
 0x1d1   : > { %931 = vmatpush1.bf16.msra.mxu1 %v1269_v18  ;;  %v1257_v18 = vcombine.low %v532_v7, %v536_v8 }
 0x1d2   : > { %1002 = vmatprep.subr.bf16.mxu1 %v1218_v27  ;;  %v1272_v27 = vcombine.high %v547_v21, %v551_v22 }
 0x287   : > { %v479_v30 = vpop.f32.mrb[0].mxu1 }
 0x288   : > { %v480_v31 = vadd.f32 %v1205_v29, %v479_v30  ;;  %v1304_v32 = vpop.f32.mrb[1].mxu1  ;;  %v1273_v30 = vcombine.low %v548_v23, %v552_v24 }
 0x289   : > { %v482_v33 = vpop.f32.mrb[2].mxu1 }
 0x28a   : > { %v483_v34 = vadd.f32 %v1205_v29, %v482_v33  ;;  %v1305_v35 = vpop.f32.mrb[3].mxu1  ;;  %v486_v40 = vmax.f32 %v480_v31, 0.0  ;;  %v1271_v29 = vcombine.low %v547_v21, %v551_v22 }
 0x28c   : > { %v487_v41 = vmax.f32 %v483_v34, 0.0 }
 0x28e   : > { %v1827_v42 = vpack.c.bf16 %v487_v41, %v486_v40 }
 0x290   : > { %906 = vmatmul.mubr.bf16.vlgmr.msra.gmra.mrb[4].mxu0 %v1827_v42  ;;  %949 = vmatmul.mubr.bf16.vlgmr.msra.gmra.mrb[4].mxu1 %v1827_v42 }
 0x291   : > { %960 = vmatpush1.bf16.msra.mxu0 %v1215_v25  ;;  %1003 = vmatpush1.bf16.msra.mxu1 %v1217_v26  ;;  %v1263_v25 = vcombine.low %v539_v13, %v543_v14  ;;  %v1265_v26 = vcombine.low %v540_v15, %v544_v16 }
 0x292   : > { %961 = vmatprep.subr.bf16.mxu0 %v1224_v43  ;;  %1004 = vmatprep.subr.bf16.mxu1 %v1226_v44 }
 0x293   : > { %991 = vmatprep.mubr.bf16.mxu0 %v1584_v28  ;;  %1034 = vmatprep.mubr.bf16.mxu1 %v1584_v28  ;;  %v1274_v28 = vcombine.high %v548_v23, %v552_v24 }
 0x295   : > { %962 = vmatpush1.bf16.msra.mxu0 %v1223_v49  ;;  %1005 = vmatpush1.bf16.msra.mxu1 %v1225_v50 }
 0x296   : > { %963 = vmatprep.subr.bf16.mxu0 %v1232_v51  ;;  %1006 = vmatprep.subr.bf16.mxu1 %v1234_v52 }
 0x299   : > { %964 = vmatpush1.bf16.msra.mxu0 %v1231_v57  ;;  %1007 = vmatpush1.bf16.msra.mxu1 %v1233_v58 }
 0x29a   : > { %965 = vmatprep.subr.bf16.mxu0 %v1240_v59  ;;  %1008 = vmatprep.subr.bf16.mxu1 %v1242_v60 }
 0x29d   : > { %966 = vmatpush1.bf16.msra.mxu0 %v1239_v1  ;;  %1009 = vmatpush1.bf16.msra.mxu1 %v1241_v2 }
 0x29e   : > { %967 = vmatprep.subr.bf16.mxu0 %v1248_v3  ;;  %1010 = vmatprep.subr.bf16.mxu1 %v1250_v4 }
 0x2a1   : > { %968 = vmatpush1.bf16.msra.mxu0 %v1247_v9  ;;  %1011 = vmatpush1.bf16.msra.mxu1 %v1249_v10 }
 0x2a2   : > { %969 = vmatprep.subr.bf16.mxu0 %v1256_v11  ;;  %1012 = vmatprep.subr.bf16.mxu1 %v1258_v12 }
 0x2a5   : > { %970 = vmatpush1.bf16.msra.mxu0 %v1255_v17  ;;  %1013 = vmatpush1.bf16.msra.mxu1 %v1257_v18 }
 0x2a6   : > { %971 = vmatprep.subr.bf16.mxu0 %v1264_v19  ;;  %1014 = vmatprep.subr.bf16.mxu1 %v1266_v20 }
 0x2a9   : > { %972 = vmatpush1.bf16.msra.mxu0 %v1263_v25  ;;  %1015 = vmatpush1.bf16.msra.mxu1 %v1265_v26 }
 0x2aa   : > { %973 = vmatprep.subr.bf16.mxu0 %v1272_v27  ;;  %1016 = vmatprep.subr.bf16.mxu1 %v1274_v28 }
 0x2ad   : > { %974 = vmatpush1.bf16.msra.mxu0 %v1271_v29  ;;  %1017 = vmatpush1.bf16.msra.mxu1 %v1273_v30 }
 0x2b0   : > { %992 = vmatmul.mubr.bf16.vlgmr.msra.gmra.mrb[8].mxu0 %v1827_v42  ;;  %1035 = vmatmul.mubr.bf16.vlgmr.msra.gmra.mrb[8].mxu1 %v1827_v42 }
 0x363   : > { %v907_v31 = vpop.f32.mrb[4].mxu0  ;;  %v950_v32 = vpop.f32.mrb[4].mxu1 }
 0x364   : > { %v909_v33 = vpop.f32.mrb[5].mxu0  ;;  %v952_v34 = vpop.f32.mrb[5].mxu1 }
 0x365   : > { %v911_v35 = vpop.f32.mrb[6].mxu0  ;;  %v954_v36 = vpop.f32.mrb[6].mxu1 }
 0x366   : > { %v1045_v37 = vmax.f32 %v907_v31, %v911_v35  ;;  %v1047_v38 = vmax.f32 %v950_v32, %v954_v36  ;;  %v913_v39 = vpop.f32.mrb[7].mxu0  ;;  %v956_v40 = vpop.f32.mrb[7].mxu1 }
 0x367   : > { %v1046_v41 = vmax.f32 %v909_v33, %v913_v39  ;;  %v1048_v43 = vmax.f32 %v952_v34, %v956_v40 }
 0x368   : > { %1069 = vst [vmem:[%s310_s19] sm:$0xff] %v1045_v37  ;;  %1071 = vst [vmem:[%s310_s19 + $0x10] sm:$0xff] %v1047_v38 }
 0x369   : > { %1070 = vst [vmem:[%s310_s19 + $0x8] sm:$0xff] %v1046_v41  ;;  %1072 = vst [vmem:[%s310_s19 + $0x18] sm:$0xff] %v1048_v43 }
 0x383   : > { %v993_v42 = vpop.f32.mrb[8].mxu0  ;;  %v1036_v44 = vpop.f32.mrb[8].mxu1 }
 0x384   : > { %v995_v45 = vpop.f32.mrb[9].mxu0  ;;  %v1038_v46 = vpop.f32.mrb[9].mxu1 }
 0x385   : > { %v997_v47 = vpop.f32.mrb[10].mxu0  ;;  %v1040_v48 = vpop.f32.mrb[10].mxu1 }
 0x386   : > { %v1049_v49 = vmax.f32 %v993_v42, %v997_v47  ;;  %v1051_v50 = vmax.f32 %v1036_v44, %v1040_v48  ;;  %v999_v51 = vpop.f32.mrb[11].mxu0  ;;  %v1042_v52 = vpop.f32.mrb[11].mxu1 }
 0x387   : > { %v1050_v53 = vmax.f32 %v995_v45, %v999_v51  ;;  %v1052_v54 = vmax.f32 %v1038_v46, %v1042_v52 }
 0x388   : > { %1073 = vst [vmem:[%s310_s19 + $0x20] sm:$0xff] %v1049_v49  ;;  %1075 = vst [vmem:[%s310_s19 + $0x30] sm:$0xff] %v1051_v50 }
 0x389   : > { %1074 = vst [vmem:[%s310_s19 + $0x28] sm:$0xff] %v1050_v53  ;;  %1076 = vst [vmem:[%s310_s19 + $0x38] sm:$0xff] %v1052_v54 }
 0x38a   : > { %1500 = shalt.err (!%p1497_p11)
}
 0x38b   : > { %s1501_s17 = scalar_lea.hbm %s1838_s28, 1024  ;;  %s1505_s13 = scalar_lea.hbm %s1893_s6, 2048 }
 0x38c   : > { %p1502_p0 = scmp.ne.s32.totalorder %s1838_s28, %s1501_s17  ;;  %p1506_p6 = scmp.lt.u32.totalorder %s1838_s28, %s1893_s6 }
 0x38d   : > { %p1507_p7 = scmp.lt.u32.totalorder %s1505_s13, %s1501_s17  ;;  %p1509_p8 = scmp.lt.u32.totalorder %s1501_s17, %s1838_s28 }
 0x38e   : > { %p1503_p4 = pnand %p1502_p0, %p1910_p2 }
 0x38f   : > { %p1508_p12 = por %p1507_p7, %p1506_p6 }
 0x390   : > { %p1504_p13 = pneg %p1503_p4 }
 0x391   : > { %p1510_p1 = por %p1509_p8, %p1508_p12 }
 0x393   : > { %p1511_p10 = pnand %p1510_p1, %p1504_p13 }
 0x395   : > { %1514 = shalt.err (!%p1511_p10)
}
 0x396   : > { %1316 = dma.vmem_to_hbm [thread:$0]  (%p1910_p2), %s1840_s12, 1024, %s1838_s28, %s1078_s11  }
 0x397 PF: > { %s1911_s30 = sld [smem:[#allocation12_spill]]  ;;  %s1104_s14 = sand.u32 1, %s1553_s21  }
 0x398   : > { %p1913_p5 = scmp.ge.s32.totalorder %s1573_s26, 2  ;;  %s1105_s20 = scalar_lea.sflag [#allocation4], %s1104_s14 }
 0x39d   : > { %p1912_p3 = scmp.ne.s32.totalorder %s1911_s30, 0 }
 0x39f   : > { %p1330_p9 = pnand %p1913_p5, %p1912_p3 }
 0x3a1   : > { %1548 = dma.done.wait (!%p1330_p9), %s1105_s20, 1024  }
 0x3a2   : > { %1550 = vsyncadd (!%p1330_p9), %s1105_s20, 4294966272  ;;  %s23_s26 = sadd.s32 1, %s1573_s26   ;;  %s1914_s21 = smov %s1557_s22 }
 0x3a3   : > { %p20_p11 = scmp.ge.s32.totalorder %s23_s26, 4   ;;  %s1915_s22 = smov %s1561_s23 }
 0x3a4   : > { %s1916_s23 = smov %s1763_s27  ;;  %s1917_s24 = smov %s1569_s25 }
 0x3a5   : > { %s1918_s25 = smov %s1920_s16  ;;  %22 = sbr.rel (!%p20_p11) target bundleno = 7 (0x7), region = 101 }
 0x3ac   :  { %1110 = vsyncpa [#allocation3], 1 }
 0x3ad   :  { %1112 = vsyncpa [#allocation3 + $0x1], 1 }
 0x3ae   :  { %1113 = vsyncpa [#allocation6], 1 }
 0x3af   :  { %1114 = vsyncpa [#allocation4], 1 }
 0x3b0   :  { %1116 = vsyncpa [#allocation4 + $0x1], 1 }

</bundles_post_ra>
